<compile_context>
chip_gen: v7x
topology: tpu7x:2x2x1
jax: 0.10.0
libtpu: 0.0.40
codegen_flags: <defaults>
</compile_context>

<pallas_src>
import jax
import jax.numpy as jnp
from jax.experimental import pallas as pl
from jax.experimental.pallas import tpu as pltpu


def _mlp_kernel(obs_ref, act_ref,
                w1o_ref, w1a_ref, b1_ref,
                w2_ref, b2_ref,
                w3_ref, b3_ref,
                o_ref):
    # Layer 1: fused concat via split matmul on the MXU, f32 accumulation.
    h1 = (jnp.dot(obs_ref[...], w1o_ref[...], preferred_element_type=jnp.float32)
          + jnp.dot(act_ref[...], w1a_ref[...], preferred_element_type=jnp.float32)
          + b1_ref[...])
    h1 = jnp.maximum(h1, 0.0)                                   # ReLU (VPU)

    # Layer 2.
    h2 = jnp.dot(h1, w2_ref[...], preferred_element_type=jnp.float32) + b2_ref[...]
    h2 = jnp.maximum(h2, 0.0)                                   # ReLU (VPU)

    # Output head (no activation), lane-dense: (8, H2) @ (tb, H2)^T -> (8, tb).
    # Row 0 of w3_ref holds the real head weights (rows 1..7 are zero padding),
    # so head[0:1, :] is the (1, tb) result with batch on lanes.
    head = jax.lax.dot_general(
        w3_ref[...], h2,
        dimension_numbers=(((1,), (1,)), ((), ())),
        preferred_element_type=jnp.float32)
    o_ref[...] = (head[0:1, :] + b3_ref[...]).astype(o_ref.dtype)


def maddpg_value_forward(joint_observation, joint_action, params, *, block_rows=4096):
    """params = (w1, b1, w2, b2, w3, b3); returns [B, 1] values."""
    w1, b1, w2, b2, w3, b3 = params
    batch, d_obs = joint_observation.shape
    d_act = joint_action.shape[-1]
    h1_dim = w1.shape[1]
    h2_dim = w2.shape[1]

    # Split W1 at trace time: fused concat without an in-kernel ref slice.
    w1_obs = w1[:d_obs, :]
    w1_act = w1[d_obs:, :]
    # Head weight padded to 8 sublanes (row 0 real, rows 1..7 zero) so the head
    # matmul has a sublane-aligned LHS and a lane-dense (.., tb) result.
    w3_pad = jnp.zeros((8, h2_dim), w3.dtype).at[0, :].set(w3.reshape(-1))
    b1r = b1.reshape(1, h1_dim)
    b2r = b2.reshape(1, h2_dim)
    b3r = b3.reshape(1, 1)

    # Batch tile: lane-aligned multiple of 128 for the multi-tile case (keeps
    # the (1, tb) output block 128-aligned); a single minimal tile otherwise.
    block_rows = max(128, (block_rows // 128) * 128)
    if batch <= block_rows:
        tb = max(8, ((batch + 7) // 8) * 8)
        num_tiles = 1
    else:
        tb = block_rows
        num_tiles = pl.cdiv(batch, tb)
    padded = num_tiles * tb

    # VMEM budget: ~4.2 KiB per tile row (two lane-padded input buffers,
    # activations, lane-dense output), with margin; capped below v7x's 64 MiB.
    vmem_limit = int(min(56 * 1024 * 1024,
                         max(32 * 1024 * 1024, tb * 6656 + (2 << 20))))

    def batch_spec(feat):
        # Batch-tiled input: block i covers rows [i*tb, (i+1)*tb). The last
        # block may run past `batch`; those rows are garbage and discarded.
        return pl.BlockSpec((tb, feat), lambda i: (i, 0))

    def const_spec(arr):
        # Weight/bias: whole array, same block every step -> VMEM-resident.
        return pl.BlockSpec(arr.shape, lambda i: (0,) * arr.ndim)

    out = pl.pallas_call(
        _mlp_kernel,
        out_shape=jax.ShapeDtypeStruct((1, padded), jnp.float32),
        grid=(num_tiles,),
        in_specs=[
            batch_spec(d_obs),
            batch_spec(d_act),
            const_spec(w1_obs),
            const_spec(w1_act),
            const_spec(b1r),
            const_spec(w2),
            const_spec(b2r),
            const_spec(w3_pad),
            const_spec(b3r),
        ],
        # Lane-dense output: grid step i writes lanes [i*tb, (i+1)*tb).
        out_specs=pl.BlockSpec((1, tb), lambda i: (0, i)),
        compiler_params=pltpu.CompilerParams(
            dimension_semantics=("parallel",),
            vmem_limit_bytes=vmem_limit),
    )(joint_observation, joint_action,
      w1_obs, w1_act, b1r, w2, b2r, w3_pad, b3r)

    return out.reshape(-1, 1)[:batch]


def init_params(key, d_in, hidden_sizes):
    """Deterministic synthetic init for MLP([d_in, *hidden_sizes, 1])."""
    sizes = [d_in, *hidden_sizes, 1]
    params = []
    for i in range(len(sizes) - 1):
        key, wk, bk = jax.random.split(key, 3)
        w = jax.random.normal(wk, (sizes[i], sizes[i + 1]), jnp.float32) / jnp.sqrt(sizes[i])
        b = 0.1 * jax.random.normal(bk, (sizes[i + 1],), jnp.float32)
        params += [w, b]
    return tuple(params)


def reference_forward(joint_observation, joint_action, params):
    """Pure-JAX reference (mirrors the PyTorch module exactly)."""
    w1, b1, w2, b2, w3, b3 = params
    x = jnp.concatenate([joint_observation, joint_action], axis=-1)
    h1 = jnp.maximum(x @ w1 + b1, 0.0)
    h2 = jnp.maximum(h1 @ w2 + b2, 0.0)
    return h2 @ w3 + b3


if __name__ == "__main__":
    # Small multi-agent setup: 2 agents, obs_dims=[6, 6], action_dims=[2, 2].
    obs_dims = [6, 6]
    action_dims = [2, 2]
    hidden_sizes = [32, 32]

    d_obs = sum(obs_dims)      # 12
    d_act = sum(action_dims)   # 4
    d_in = d_obs + d_act       # 16

    key = jax.random.PRNGKey(0)
    k_obs, k_act, k_params = jax.random.split(key, 3)
    params = init_params(k_params, d_in, hidden_sizes)

    # Case 1: tiny batch, single tile (tb == batch).
    batch = 8
    obs = jax.random.normal(k_obs, (batch, d_obs), jnp.float32)
    act = jax.random.normal(k_act, (batch, d_act), jnp.float32)
    out = jax.block_until_ready(maddpg_value_forward(obs, act, params))
    ref = reference_forward(obs, act, params)
    assert out.shape == (batch, 1), out.shape
    assert jnp.allclose(out, ref, atol=1e-4, rtol=1e-4), (out, ref)

    # Case 2: ragged batch over multiple tiles (exercises the no-pad boundary
    # block path: rows past `batch` in the last tile are garbage and sliced off).
    batch2 = 300
    obs2 = jax.random.normal(jax.random.fold_in(k_obs, 1), (batch2, d_obs), jnp.float32)
    act2 = jax.random.normal(jax.random.fold_in(k_act, 1), (batch2, d_act), jnp.float32)
    out2 = jax.block_until_ready(
        maddpg_value_forward(obs2, act2, params, block_rows=128))
    ref2 = reference_forward(obs2, act2, params)
    assert out2.shape == (batch2, 1), out2.shape
    assert jnp.allclose(out2, ref2, atol=1e-4, rtol=1e-4), (out2, ref2)

    print("KERNEL_OK")
</pallas_src>

<mosaic_0001>
module attributes {stable_mosaic.version = 11 : i64} {
  func.func @_mlp_kernel(%arg0: i32, %arg1: memref<8x12xf32, #tpu.memory_space<vmem>>, %arg2: memref<8x4xf32, #tpu.memory_space<vmem>>, %arg3: memref<12x32xf32, #tpu.memory_space<vmem>>, %arg4: memref<4x32xf32, #tpu.memory_space<vmem>>, %arg5: memref<1x32xf32, #tpu.memory_space<vmem>>, %arg6: memref<32x32xf32, #tpu.memory_space<vmem>>, %arg7: memref<1x32xf32, #tpu.memory_space<vmem>>, %arg8: memref<8x32xf32, #tpu.memory_space<vmem>>, %arg9: memref<1x1xf32, #tpu.memory_space<vmem>>, %arg10: memref<1x8xf32, #tpu.memory_space<vmem>>) attributes {dimension_semantics = [#tpu.dimension_semantics<parallel>], iteration_bounds = array<i64: 1>, scalar_prefetch = 0 : i64, scratch_operands = 0 : i64, tpu.core_type = #tpu.core_type<tc>, window_params = [{transform_indices = @transform_0, window_bounds = array<i64: 8, 12>}, {transform_indices = @transform_1, window_bounds = array<i64: 8, 4>}, {pipeline_mode = #tpu.pipeline_mode<synchronous>, transform_indices = @transform_2, window_bounds = array<i64: 12, 32>}, {pipeline_mode = #tpu.pipeline_mode<synchronous>, transform_indices = @transform_3, window_bounds = array<i64: 4, 32>}, {pipeline_mode = #tpu.pipeline_mode<synchronous>, transform_indices = @transform_4, window_bounds = array<i64: 1, 32>}, {pipeline_mode = #tpu.pipeline_mode<synchronous>, transform_indices = @transform_5, window_bounds = array<i64: 32, 32>}, {pipeline_mode = #tpu.pipeline_mode<synchronous>, transform_indices = @transform_6, window_bounds = array<i64: 1, 32>}, {pipeline_mode = #tpu.pipeline_mode<synchronous>, transform_indices = @transform_7, window_bounds = array<i64: 8, 32>}, {pipeline_mode = #tpu.pipeline_mode<synchronous>, transform_indices = @transform_8, window_bounds = array<i64: 1, 1>}, {transform_indices = @transform_9, window_bounds = array<i64: 1, 8>}]} {
    %c0 = arith.constant 0 : index
    %c0_0 = arith.constant 0 : index
    %0 = vector.load %arg1[%c0, %c0_0] : memref<8x12xf32, #tpu.memory_space<vmem>>, vector<8x12xf32>
    %c0_1 = arith.constant 0 : index
    %c0_2 = arith.constant 0 : index
    %1 = vector.load %arg3[%c0_1, %c0_2] : memref<12x32xf32, #tpu.memory_space<vmem>>, vector<12x32xf32>
    %cst = arith.constant dense<0.000000e+00> : vector<8x32xf32>
    %2 = tpu.matmul %0, %1, %cst {dimension_numbers = #tpu.dot_dimension_numbers<[1], [0], [0], [1], [0, 0, 1, 1], [], []>} : vector<8x12xf32>, vector<12x32xf32>, vector<8x32xf32> -> vector<8x32xf32>
    %c0_3 = arith.constant 0 : index
    %c0_4 = arith.constant 0 : index
    %3 = vector.load %arg2[%c0_3, %c0_4] : memref<8x4xf32, #tpu.memory_space<vmem>>, vector<8x4xf32>
    %c0_5 = arith.constant 0 : index
    %c0_6 = arith.constant 0 : index
    %4 = vector.load %arg4[%c0_5, %c0_6] : memref<4x32xf32, #tpu.memory_space<vmem>>, vector<4x32xf32>
    %cst_7 = arith.constant dense<0.000000e+00> : vector<8x32xf32>
    %5 = tpu.matmul %3, %4, %cst_7 {dimension_numbers = #tpu.dot_dimension_numbers<[1], [0], [0], [1], [0, 0, 1, 1], [], []>} : vector<8x4xf32>, vector<4x32xf32>, vector<8x32xf32> -> vector<8x32xf32>
    %6 = arith.addf %2, %5 : vector<8x32xf32>
    %c0_8 = arith.constant 0 : index
    %c0_9 = arith.constant 0 : index
    %7 = vector.load %arg5[%c0_8, %c0_9] : memref<1x32xf32, #tpu.memory_space<vmem>>, vector<1x32xf32>
    %8 = vector.broadcast %7 : vector<1x32xf32> to vector<8x32xf32>
    %9 = arith.addf %6, %8 : vector<8x32xf32>
    %cst_10 = arith.constant 0.000000e+00 : f32
    %10 = vector.broadcast %cst_10 : f32 to vector<8x32xf32>
    %11 = arith.maximumf %9, %10 : vector<8x32xf32>
    %c0_11 = arith.constant 0 : index
    %c0_12 = arith.constant 0 : index
    %12 = vector.load %arg6[%c0_11, %c0_12] : memref<32x32xf32, #tpu.memory_space<vmem>>, vector<32x32xf32>
    %cst_13 = arith.constant dense<0.000000e+00> : vector<8x32xf32>
    %13 = tpu.matmul %11, %12, %cst_13 {dimension_numbers = #tpu.dot_dimension_numbers<[1], [0], [0], [1], [0, 0, 1, 1], [], []>} : vector<8x32xf32>, vector<32x32xf32>, vector<8x32xf32> -> vector<8x32xf32>
    %c0_14 = arith.constant 0 : index
    %c0_15 = arith.constant 0 : index
    %14 = vector.load %arg7[%c0_14, %c0_15] : memref<1x32xf32, #tpu.memory_space<vmem>>, vector<1x32xf32>
    %15 = vector.broadcast %14 : vector<1x32xf32> to vector<8x32xf32>
    %16 = arith.addf %13, %15 : vector<8x32xf32>
    %cst_16 = arith.constant 0.000000e+00 : f32
    %17 = vector.broadcast %cst_16 : f32 to vector<8x32xf32>
    %18 = arith.maximumf %16, %17 : vector<8x32xf32>
    %c0_17 = arith.constant 0 : index
    %c0_18 = arith.constant 0 : index
    %19 = vector.load %arg8[%c0_17, %c0_18] : memref<8x32xf32, #tpu.memory_space<vmem>>, vector<8x32xf32>
    %cst_19 = arith.constant dense<0.000000e+00> : vector<8x8xf32>
    %20 = tpu.matmul %19, %18, %cst_19 {dimension_numbers = #tpu.dot_dimension_numbers<[1], [1], [0], [0], [0, 0, 1, 0], [], []>} : vector<8x32xf32>, vector<8x32xf32>, vector<8x8xf32> -> vector<8x8xf32>
    %21 = vector.extract_strided_slice %20 {offsets = [0, 0], sizes = [1, 8], strides = [1, 1]} : vector<8x8xf32> to vector<1x8xf32>
    %c0_20 = arith.constant 0 : index
    %c0_21 = arith.constant 0 : index
    %22 = vector.load %arg9[%c0_20, %c0_21] : memref<1x1xf32, #tpu.memory_space<vmem>>, vector<1x1xf32>
    %23 = vector.broadcast %22 : vector<1x1xf32> to vector<1x8xf32>
    %24 = arith.addf %21, %23 : vector<1x8xf32>
    %c0_22 = arith.constant 0 : index
    %c0_23 = arith.constant 0 : index
    %25 = vector.load %arg10[%c0_22, %c0_23] : memref<1x8xf32, #tpu.memory_space<vmem>>, vector<1x8xf32>
    tpu.vector_store %arg10[%c0_22, %c0_23], %24 {strides = array<i32>} : memref<1x8xf32, #tpu.memory_space<vmem>>, vector<1x8xf32>,
    return
  }
  func.func @transform_0(%arg0: i32) -> (i32, i32) {
    %c0_i32 = arith.constant 0 : i32
    %c0_i32_0 = arith.constant 0 : i32
    return %arg0, %c0_i32 : i32, i32
  }
  func.func @transform_1(%arg0: i32) -> (i32, i32) {
    %c0_i32 = arith.constant 0 : i32
    %c0_i32_0 = arith.constant 0 : i32
    return %arg0, %c0_i32 : i32, i32
  }
  func.func @transform_2(%arg0: i32) -> (i32, i32) {
    %c0_i32 = arith.constant 0 : i32
    %c0_i32_0 = arith.constant 0 : i32
    %c0_i32_1 = arith.constant 0 : i32
    return %c0_i32, %c0_i32_0 : i32, i32
  }
  func.func @transform_3(%arg0: i32) -> (i32, i32) {
    %c0_i32 = arith.constant 0 : i32
    %c0_i32_0 = arith.constant 0 : i32
    %c0_i32_1 = arith.constant 0 : i32
    return %c0_i32, %c0_i32_0 : i32, i32
  }
  func.func @transform_4(%arg0: i32) -> (i32, i32) {
    %c0_i32 = arith.constant 0 : i32
    %c0_i32_0 = arith.constant 0 : i32
    %c0_i32_1 = arith.constant 0 : i32
    return %c0_i32, %c0_i32_0 : i32, i32
  }
  func.func @transform_5(%arg0: i32) -> (i32, i32) {
    %c0_i32 = arith.constant 0 : i32
    %c0_i32_0 = arith.constant 0 : i32
    %c0_i32_1 = arith.constant 0 : i32
    return %c0_i32, %c0_i32_0 : i32, i32
  }
  func.func @transform_6(%arg0: i32) -> (i32, i32) {
    %c0_i32 = arith.constant 0 : i32
    %c0_i32_0 = arith.constant 0 : i32
    %c0_i32_1 = arith.constant 0 : i32
    return %c0_i32, %c0_i32_0 : i32, i32
  }
  func.func @transform_7(%arg0: i32) -> (i32, i32) {
    %c0_i32 = arith.constant 0 : i32
    %c0_i32_0 = arith.constant 0 : i32
    %c0_i32_1 = arith.constant 0 : i32
    return %c0_i32, %c0_i32_0 : i32, i32
  }
  func.func @transform_8(%arg0: i32) -> (i32, i32) {
    %c0_i32 = arith.constant 0 : i32
    %c0_i32_0 = arith.constant 0 : i32
    %c0_i32_1 = arith.constant 0 : i32
    return %c0_i32, %c0_i32_0 : i32, i32
  }
  func.func @transform_9(%arg0: i32) -> (i32, i32) {
    %c0_i32 = arith.constant 0 : i32
    %c0_i32_0 = arith.constant 0 : i32
    return %c0_i32, %arg0 : i32, i32
  }
}

</mosaic_0001>

<bundles_post_ra>
// kernel: tpu_custom_call.1
= control target key start
LH: loop header
LB: loop body
LE: loop exit
PB: predicated region body
PF: predicated region fallthrough
CT: control target
= control target key end

     0   :  { %s738_s0 = inlined_call_operand.hbm [shape: f32[8,12], index: 0, kind: input, shape index: {}]   ;;  %s739_s1 = inlined_call_operand.vmem [shape: f32[8,4], index: 1, kind: input, shape index: {}]   ;;  %s740_s2 = inlined_call_operand.hbm [shape: f32[12,32], index: 2, kind: input, shape index: {}]   ;;  %s741_s3 = inlined_call_operand.hbm [shape: f32[4,32], index: 3, kind: input, shape index: {}]   ;;  %s742_s4 = inlined_call_operand.vmem [shape: f32[1,32], index: 4, kind: input, shape index: {}]   ;;  %s743_s5 = inlined_call_operand.vmem [shape: f32[32,32], index: 5, kind: input, shape index: {}]   ;;  %s744_s6 = inlined_call_operand.vmem [shape: f32[1,32], index: 6, kind: input, shape index: {}]   ;;  %s745_s7 = inlined_call_operand.vmem [shape: f32[8,32], index: 7, kind: input, shape index: {}]   ;;  %s746_s8 = inlined_call_operand.<no memory space> [shape: f32[1,1], index: 8, kind: input, shape index: {}]   ;;  %s747_s9 = inlined_call_operand.hbm [shape: f32[1,8], index: 9, kind: output, shape index: {}]  }
   0x1   :  { %v14_v0 = vstv %s746_s8 }
   0x2   :  { %15 = vst [vmem:[#allocation2] sm:$0x1] %v14_v0 }
   0x3   :  { %16 = vsyncpa [#allocation4], 0 }
   0x4   :  { %17 = vsyncpa [#allocation7], 0 }
   0x5   :  { %18 = vsyncpa [#allocation5], 0  ;;  %s598_s11 = smov [#allocation6]   ;;  %s504_s15 = scalar_lea.hbm %s740_s2, 256 }
   0x6   :  { %s36_s12 = sshll.u32 %s598_s11, 4  ;;  %p505_p0 = scmp.ne.s32.totalorder %s740_s2, %s504_s15  ;;  %s37_s12 = int_to_ptr.vmem [resolvable:$true] %s36_s12 }
   0x7   :  { %p508_p1 = scmp.lt.u32.totalorder %s504_s15, %s740_s2 }
   0x9   :  { %p510_p2 = pnand %p508_p1, %p505_p0 }
   0xb   :  { %513 = shalt.err (!%p510_p2)
}
   0xc   :  { %s514_s8 = scalar_lea.vmem %s37_s12, 256  ;;  %p519_p4 = scmp.lt.s32.totalorder %s37_s12, %s37_s12 }
   0xd   :  { %p515_p3 = scmp.ne.s32.totalorder %s37_s12, %s514_s8  ;;  %p520_p5 = scmp.lt.s32.totalorder %s514_s8, %s514_s8 }
   0xf   :  { %p521_p6 = por %p520_p5, %p519_p4 }
  0x11   :  { %p522_p7 = pnand %p521_p6, %p515_p3 }
  0x13   :  { %525 = shalt.err (!%p522_p7)
}
  0x14   :  { %s599_s20 = smov 128   ;;  %s600_s21 = smov 8  }
  0x15   :  { %42 = dma.hbm_to_vmem [thread:$0]  %s740_s2, 256, %s37_s12, [#allocation7], %s599_s20, %s599_s20, %s600_s21  }
  0x16   :  { %s601_s24 = smov [#allocation3]   ;;  %s602_s26 = smov [#allocation8]  }
  0x17   :  { %s25_s25 = sshll.u32 %s601_s24, 4  ;;  %s49_s27 = sshll.u32 %s602_s26, 4  ;;  %s26_s25 = int_to_ptr.vmem [resolvable:$true] %s25_s25  ;;  %s50_s27 = int_to_ptr.vmem [resolvable:$true] %s49_s27 }
  0x18   :  { %s526_s30 = scalar_lea.hbm %s738_s0, 128 }
  0x19   :  { %p527_p8 = scmp.ne.s32.totalorder %s738_s0, %s526_s30  ;;  %p530_p9 = scmp.lt.u32.totalorder %s526_s30, %s738_s0 }
  0x1b   :  { %p532_p10 = pnand %p530_p9, %p527_p8 }
  0x1d   :  { %535 = shalt.err (!%p532_p10)
}
  0x1e   :  { %s536_s2 = scalar_lea.vmem %s26_s25, 128  ;;  %p541_p12 = scmp.lt.s32.totalorder %s26_s25, %s26_s25 }
  0x1f   :  { %p537_p11 = scmp.ne.s32.totalorder %s26_s25, %s536_s2  ;;  %p542_p13 = scmp.lt.s32.totalorder %s536_s2, %s536_s2 }
  0x21   :  { %p543_p0 = por %p542_p13, %p541_p12 }
  0x23   :  { %p544_p1 = pnand %p543_p0, %p537_p11 }
  0x25   :  { %547 = shalt.err (!%p544_p1)
}
  0x26   :  { %28 = dma.hbm_to_vmem [thread:$0]  %s738_s0, 128, %s26_s25, [#allocation4]  }
  0x27   :  { %s548_s18 = scalar_lea.hbm %s741_s3, 64 }
  0x28   :  { %p549_p2 = scmp.ne.s32.totalorder %s741_s3, %s548_s18  ;;  %p552_p3 = scmp.lt.u32.totalorder %s548_s18, %s741_s3 }
  0x2a   :  { %p554_p4 = pnand %p552_p3, %p549_p2 }
  0x2c   :  { %557 = shalt.err (!%p554_p4)
}
  0x2d   :  { %s558_s22 = scalar_lea.vmem %s50_s27, 64  ;;  %p563_p6 = scmp.lt.s32.totalorder %s50_s27, %s50_s27 }
  0x2e   :  { %p559_p5 = scmp.ne.s32.totalorder %s50_s27, %s558_s22  ;;  %p564_p7 = scmp.lt.s32.totalorder %s558_s22, %s558_s22 }
  0x30   :  { %p565_p8 = por %p564_p7, %p563_p6 }
  0x32   :  { %p566_p9 = pnand %p565_p8, %p559_p5 }
  0x34   :  { %569 = shalt.err (!%p566_p9)
}
  0x35   :  { %52 = dma.hbm_to_vmem [thread:$0]  %s741_s3, 64, %s50_s27, [#allocation7]  }
  0x36   :  { %592 = dma.done.wait [#allocation4], 128  }
  0x37   :  { %593 = vsyncadd [#allocation4], 4294967168 }
  0x38   :  { %594 = dma.done.wait [#allocation7], 320  }
  0x39   :  { %595 = vsyncadd [#allocation7], 4294966976  ;;  %v603_v1 = vmov 0.0|0.0   ;;  %v604_v2 = vmov 0.0   ;;  %vm605_vm0 = vmmov 0   ;;  %vm81_vm1 = vcmask 1043456  }
  0x3a   :  { %482 = vmatprep.subr.bf16.mxu1 %v603_v1  ;;  %454 = vmatprep.subr.mxu0 %v604_v2  ;;  %vm606_vm2 = vmmov 1   ;;  %vm77_vm4 = vcmask 31744   ;;  %v73_v3 = vld [vmem:[#allocation6] sm:$0xff]  ;;  %v74_v4 = vld [vmem:[#allocation6 + $0x8] sm:$0xf]  ;;  %v75_v7 = vld [vmem:[%s739_s1] sm:$0xff]  ;;  %v410_v31 = vlaneseq }
  0x3b   :  { %456 = vmatprep.mubr.msk.f32.mxu0 %vm605_vm0, %v604_v2  ;;  %463 = vmatprep.mubr.msk.f32.mxu1 %vm605_vm0, %v604_v2  ;;  %vm484_vm3 = vmpackc.low %vm81_vm1, %vm606_vm2  ;;  %v76_v5 = vld [vmem:[#allocation8] sm:$0xf]  ;;  %v483_v6 = vpack.c.bf16 %v74_v4, %v73_v3  ;;  %v72_v8 = vld [vmem:[#allocation3] sm:$0xff]  ;;  %vm155_vm5 = vcmask 97280   ;;  %vm252_vm6 = vcmask 261120   ;;  %v607_v24 = vmov 0  }
  0x3c   :  { %455 = vmatpush3.msk.msra.mxu0 %vm81_vm1, %v76_v5  ;;  %v241_v9 = vld [vmem:[%s743_s5] sm:$0xff]  ;;  %v242_v10 = vld [vmem:[%s743_s5 + $0x8] sm:$0xff]  ;;  %v243_v12 = vld [vmem:[%s743_s5 + $0x10] sm:$0xff]  ;;  %503 = vset.pattern.permute.xlu0 %v607_v24  ;;  %v411_v32 = vshrl.u32 %v410_v31, 7  ;;  %s608_s12 = smov [#allocation9]   ;;  %vm415_vm7 = vcmask 57344  }
  0x3d   :  { %457 = vmatmul.mubr.msk.f32.vlgmr.msra.gmra.mrb[0].mxu0 %vm77_vm4, %v75_v7  ;;  %486 = vmatprep.subr.bf16.mxu0 %v603_v1  ;;  %v487_v11 = vpack.c.bf16 %v242_v10, %v241_v9  ;;  %v244_v13 = vld [vmem:[%s743_s5 + $0x18] sm:$0xff]  ;;  %v437_v18 = vld [vmem:[%s742_s4] ss:$0 sm:$0xff]  ;;  %s423_s15 = sshll.u32 %s608_s12, 4  ;;  %s424_s15 = int_to_ptr.vmem [resolvable:$true] %s423_s15 }
  0x3e   :  { %485 = vmatpush3.bf16.msk.msra.mxu1 %vm484_vm3, %v483_v6  ;;  %474 = vmatprep.mubr.msk.f32.mxu0 %vm605_vm0, %v604_v2  ;;  %v490_v14 = vpack.c.bf16 %v244_v13, %v243_v12  ;;  %v404_v23 = vld [vmem:[#allocation2] sm:$0x1]  ;;  %v412_v33 = vsub.s32 0, %v411_v32  ;;  %s574_s16 = scalar_lea.vmem %s424_s15, 32  ;;  %p575_p11 = scmp.lt.s32.totalorder %s424_s15, %s424_s15 }
  0x3f   :  { %477 = vmatprep.subr.mxu1 %v604_v2  ;;  %488 = vmatpush3.bf16.msra.mxu0 %v487_v11  ;;  %v438_v25 = vld [vmem:[%s744_s6] ss:$0 sm:$0xff]  ;;  %s570_s6 = scalar_lea.vmem %s424_s15, 16 }
  0x40   :  { %489 = vmatprep.subr.bf16.mxu0 %v603_v1  ;;  %407 = vperm.xlu0 %503, %v404_v23   ;;  %v327_v30 = vld [vmem:[%s745_s7] sm:$0xff]  ;;  %p571_p10 = scmp.ne.s32.totalorder %s424_s15, %s570_s6  ;;  %p576_p12 = scmp.lt.s32.totalorder %s574_s16, %s570_s6 }
  0x41   :  { %464 = vmatmul.mubr.msk.f32.vlgmr.msra.gmra.mrb[0].mxu1 %vm155_vm5, %v72_v8 }
  0x42   :  { %479 = vmatprep.mubr.msk.f32.mxu1 %vm605_vm0, %v604_v2  ;;  %p577_p13 = por %p576_p12, %p575_p11 }
  0x43   :  { %491 = vmatpush3.bf16.msra.mxu0 %v490_v14 }
  0x44   :  { %p578_p0 = pnand %p577_p13, %p571_p10 }
  0xbf   :  { %v408_v34 = vpop.permute.xlu0 %407 }
  0xc0   :  { %v413_v35 = vrot.slane %v408_v34, %v412_v33 }
 0x110   :  { %v151_v15 = vpop.f32.mrb[0].mxu0 }
 0x111   :  { %v458_v16 = vpop.f32.mrb[1].mxu0 }
 0x114   :  { %v228_v17 = vpop.f32.mrb[0].mxu1 }
 0x115   :  { %v229_v19 = vadd.f32 %v228_v17, %v151_v15  ;;  %v465_v20 = vpop.f32.mrb[1].mxu1 }
 0x117   :  { %v239_v21 = vadd.f32 %v437_v18, %v229_v19 }
 0x119   :  { %v240_v22 = vmax.f32 %v239_v21, 0.0 }
 0x11b   :  { %475 = vmatmul.mubr.msk.f32.vlgmr.msra.gmra.mrb[2].mxu0 %vm252_vm6, %v240_v22 }
 0x1ee   :  { %v322_v26 = vpop.f32.mrb[2].mxu0 }
 0x1ef   :  { %v323_v27 = vadd.f32 %v438_v25, %v322_v26  ;;  %v476_v28 = vpop.f32.mrb[3].mxu0 }
 0x1f1   :  { %v326_v29 = vmax.f32 %v323_v27, 0.0 }
 0x1f3   :  { %478 = vmatpush3.xpose.msk.msra.mxu1 %vm252_vm6, %v326_v29 }
 0x1f6   :  { %480 = vmatmul.mubr.msk.f32.vlgmr.msra.gmra.mrb[2].mxu1 %vm252_vm6, %v327_v30 }
 0x2c9   :  { %v400_v36 = vpop.f32.mrb[2].mxu1 }
 0x2ca   :  { %v414_v37 = vadd.f32 %v413_v35, %v400_v36  ;;  %v481_v38 = vpop.f32.mrb[3].mxu1 }
 0x2cc   :  { %416 = vst.msk [vmem:[#allocation9] sm:$0x1] %vm415_vm7, %v414_v37 }
 0x2cd   :  { %581 = shalt.err (!%p578_p0)
}
 0x2ce   :  { %s582_s18 = scalar_lea.hbm %s747_s9, 16 }
 0x2cf   :  { %p583_p1 = scmp.ne.s32.totalorder %s747_s9, %s582_s18  ;;  %p586_p2 = scmp.lt.u32.totalorder %s582_s18, %s747_s9 }
 0x2d1   :  { %p588_p3 = pnand %p586_p2, %p583_p1 }
 0x2d3   :  { %591 = shalt.err (!%p588_p3)
}
 0x2d4   :  { %426 = dma.vmem_to_hbm [thread:$0]  %s424_s15, 16, %s747_s9, [#allocation5]  }
 0x2d5   :  { %596 = dma.done.wait [#allocation5], 16  }
 0x2d6   :  { %597 = vsyncadd [#allocation5], 4294967280 }
 0x2d7   :  { %430 = vsyncpa [#allocation4], 1 }
 0x2d8   :  { %431 = vsyncpa [#allocation7], 1 }
 0x2d9   :  { %432 = vsyncpa [#allocation5], 1 }

</bundles_post_ra>
